<compile_context>
chip_gen: v7x
topology: tpu7x:2x2x1
jax: 0.10.0
libtpu: 0.0.40
codegen_flags: <defaults>
</compile_context>

<pallas_src>
import math
import functools

import jax
import jax.numpy as jnp
from jax import lax
from jax.experimental import pallas as pl
from jax.experimental.pallas import tpu as pltpu

_EPS = 1e-12  # torch F.normalize default eps


def _round_up(x, m):
    return ((x + m - 1) // m) * m


def _arc_margin_kernel(fn_ref, w_ref, o_ref):
    """One grid step: cosine of the whole (pre-normalized) batch against a
    tile of `tn` class rows.

    fn_ref : (B, D)   L2-normalized features (f32), resident across the grid
    w_ref  : (tn, D)  raw class-weight tile
    o_ref  : (B, tn)  output tile
    """
    f_n = fn_ref[...]                               # already f32 & normalized
    w = w_ref[...].astype(jnp.float32)

    # (B, D) x (tn, D), contracting D of both operands -> (B, tn).
    dn = (((1,), (1,)), ((), ()))
    c = lax.dot_general(f_n, w, dimension_numbers=dn,
                        preferred_element_type=jnp.float32)

    # Per-row squared norms of the weight tile, computed as a ones-row matmul
    # so the result lands directly in lane layout (1, tn); the MXU has plenty
    # of headroom here (main matmul only uses B sublanes).
    ones_row = jnp.ones((1, w.shape[1]), jnp.float32)
    sq = lax.dot_general(ones_row, w * w, dimension_numbers=dn,
                         preferred_element_type=jnp.float32)        # (1, tn)
    inv = lax.rsqrt(jnp.maximum(sq, _EPS * _EPS))                   # EUP

    # Column scale == normalizing the weight rows before the matmul.
    o_ref[...] = (c * inv).astype(o_ref.dtype)


@functools.partial(jax.jit, static_argnames=("tn", "weight_stream_dtype"))
def arc_margin_product(features, weight, *, tn=512, weight_stream_dtype=None):
    """cosine = normalize(features) @ normalize(weight).T via Pallas."""
    B, D = features.shape
    C, D2 = weight.shape
    assert D == D2

    out_dtype = features.dtype

    # --- hoisted feature normalization (once per call, not per class tile) ---
    f32 = features.astype(jnp.float32)
    f_n = f32 * lax.rsqrt(
        jnp.maximum(jnp.sum(f32 * f32, axis=1, keepdims=True), _EPS * _EPS))

    # Optional HBM-bandwidth saver for large heads: stream the weight as bf16.
    # All norm / accumulation math stays f32 inside the kernel.
    if weight_stream_dtype is not None:
        weight = weight.astype(weight_stream_dtype)

    # --- class-axis tiling: cdiv grid + zero padding for arbitrary C ---
    tn = max(128, min(tn, _round_up(C, 128)))
    C_pad = _round_up(C, tn)
    if C_pad != C:
        # Zero rows -> zero dot products; scaled by finite rsqrt(eps^2) they
        # stay zero and are sliced off below.
        weight = jnp.pad(weight, ((0, C_pad - C), (0, 0)))
    grid = (C_pad // tn,)

    # VMEM budget: weight-tile double buffer + output-tile double buffer +
    # resident features, with headroom; capped safely under v7x's 64 MiB.
    itemsize = jnp.dtype(weight.dtype).itemsize
    est = 2 * tn * D * itemsize + 2 * B * tn * 4 + B * D * 4
    vmem_limit = int(min(max(4 * est, 16 << 20), 48 << 20))

    out = pl.pallas_call(
        _arc_margin_kernel,
        out_shape=jax.ShapeDtypeStruct((B, C_pad), out_dtype),
        grid_spec=pltpu.PrefetchScalarGridSpec(
            num_scalar_prefetch=0,
            grid=grid,
            in_specs=[
                # full normalized-feature block, resident across the grid
                pl.BlockSpec((B, D), lambda j: (0, 0)),
                # one tile of `tn` class rows per step
                # TODO(synk): consider pipeline_mode=pl.Buffered(3) on v5e if
                # profiling shows exposed DMA once tiles are large.
                pl.BlockSpec((tn, D), lambda j: (j, 0)),
            ],
            out_specs=pl.BlockSpec((B, tn), lambda j: (0, j)),
        ),
        compiler_params=pltpu.CompilerParams(
            dimension_semantics=("parallel",),  # megacore-shards classes (v7x)
            vmem_limit_bytes=vmem_limit,
        ),
    )(f_n, weight)

    return out[:, :C] if C_pad != C else out


def xavier_uniform(key, out_features, in_features, dtype=jnp.float32):
    """Deterministic xavier_uniform_ equivalent for weight of shape (out, in)."""
    bound = math.sqrt(6.0 / (in_features + out_features))
    return jax.random.uniform(key, (out_features, in_features),
                              dtype=dtype, minval=-bound, maxval=bound)


if __name__ == "__main__":
    in_features = 128    # embedding dim
    out_features = 777   # deliberately NOT a multiple of the class tile
    batch = 8

    key = jax.random.PRNGKey(0)
    k_feat, k_w = jax.random.split(key)

    features = jax.random.normal(k_feat, (batch, in_features), dtype=jnp.float32)
    weight = xavier_uniform(k_w, out_features, in_features)

    cosine = arc_margin_product(features, weight)
    cosine = jax.block_until_ready(cosine)

    # Pure-JAX reference (torch F.normalize semantics).
    def ref(f, w, eps=1e-12):
        fn = f / jnp.maximum(jnp.linalg.norm(f, axis=1, keepdims=True), eps)
        wn = w / jnp.maximum(jnp.linalg.norm(w, axis=1, keepdims=True), eps)
        return fn @ wn.T

    expected = ref(features, weight)
    assert cosine.shape == (batch, out_features)
    assert jnp.allclose(cosine, expected, atol=1e-5, rtol=1e-5)

    print("KERNEL_OK")
</pallas_src>

<mosaic_0001>
module attributes {stable_mosaic.version = 11 : i64} {
  func.func @_arc_margin_kernel(%arg0: i32, %arg1: memref<8x128xf32, #tpu.memory_space<vmem>>, %arg2: memref<512x128xf32, #tpu.memory_space<vmem>>, %arg3: memref<8x512xf32, #tpu.memory_space<vmem>>) attributes {dimension_semantics = [#tpu.dimension_semantics<parallel>], iteration_bounds = array<i64: 2>, scalar_prefetch = 0 : i64, scratch_operands = 0 : i64, tpu.core_type = #tpu.core_type<tc>, window_params = [{pipeline_mode = #tpu.pipeline_mode<synchronous>, transform_indices = @transform_0, window_bounds = array<i64: 8, 128>}, {transform_indices = @transform_1, window_bounds = array<i64: 512, 128>}, {transform_indices = @transform_2, window_bounds = array<i64: 8, 512>}]} {
    %c0 = arith.constant 0 : index
    %c0_0 = arith.constant 0 : index
    %0 = vector.load %arg1[%c0, %c0_0] : memref<8x128xf32, #tpu.memory_space<vmem>>, vector<8x128xf32>
    %c0_1 = arith.constant 0 : index
    %c0_2 = arith.constant 0 : index
    %1 = vector.load %arg2[%c0_1, %c0_2] : memref<512x128xf32, #tpu.memory_space<vmem>>, vector<512x128xf32>
    %cst = arith.constant dense<0.000000e+00> : vector<8x512xf32>
    %2 = tpu.matmul %0, %1, %cst {dimension_numbers = #tpu.dot_dimension_numbers<[1], [1], [0], [0], [0, 0, 1, 0], [], []>} : vector<8x128xf32>, vector<512x128xf32>, vector<8x512xf32> -> vector<8x512xf32>
    %cst_3 = arith.constant 1.000000e+00 : f32
    %3 = vector.broadcast %cst_3 : f32 to vector<1x128xf32>
    %4 = arith.mulf %1, %1 : vector<512x128xf32>
    %cst_4 = arith.constant dense<0.000000e+00> : vector<1x512xf32>
    %5 = tpu.matmul %3, %4, %cst_4 {dimension_numbers = #tpu.dot_dimension_numbers<[1], [1], [0], [0], [0, 0, 1, 0], [], []>} : vector<1x128xf32>, vector<512x128xf32>, vector<1x512xf32> -> vector<1x512xf32>
    %cst_5 = arith.constant 1.000000e-24 : f32
    %6 = vector.broadcast %cst_5 : f32 to vector<1x512xf32>
    %7 = arith.maximumf %5, %6 : vector<1x512xf32>
    %8 = math.rsqrt %7 : vector<1x512xf32>
    %9 = vector.broadcast %8 : vector<1x512xf32> to vector<8x512xf32>
    %10 = arith.mulf %2, %9 : vector<8x512xf32>
    %c0_6 = arith.constant 0 : index
    %c0_7 = arith.constant 0 : index
    %11 = vector.load %arg3[%c0_6, %c0_7] : memref<8x512xf32, #tpu.memory_space<vmem>>, vector<8x512xf32>
    tpu.vector_store %arg3[%c0_6, %c0_7], %10 {strides = array<i32>} : memref<8x512xf32, #tpu.memory_space<vmem>>, vector<8x512xf32>,
    return
  }
  func.func @transform_0(%arg0: i32) -> (i32, i32) {
    %c0_i32 = arith.constant 0 : i32
    %c0_i32_0 = arith.constant 0 : i32
    %c0_i32_1 = arith.constant 0 : i32
    return %c0_i32, %c0_i32_0 : i32, i32
  }
  func.func @transform_1(%arg0: i32) -> (i32, i32) {
    %c0_i32 = arith.constant 0 : i32
    %c0_i32_0 = arith.constant 0 : i32
    return %arg0, %c0_i32 : i32, i32
  }
  func.func @transform_2(%arg0: i32) -> (i32, i32) {
    %c0_i32 = arith.constant 0 : i32
    %c0_i32_0 = arith.constant 0 : i32
    return %c0_i32, %arg0 : i32, i32
  }
}

</mosaic_0001>

<bundles_post_ra>
// kernel: arc_margin_product.1
= control target key start
LH: loop header
LB: loop body
LE: loop exit
PB: predicated region body
PF: predicated region fallthrough
CT: control target
= control target key end

     0   :  { %s964_s9 = smov 0   ;;  %s1384_s0 = inlined_call_operand.vmem [shape: f32[8,128], index: 0, kind: input, shape index: {}]   ;;  %s1385_s1 = inlined_call_operand.vmem [shape: f32[1024,128], index: 1, kind: input, shape index: {}]   ;;  %s1386_s2 = inlined_call_operand.vmem [shape: f32[8,1024], index: 2, kind: output, shape index: {}]  }
   0x1 LB: > { %s648_s10 = sadd.s32 4294967295, %s946_s9   ;;  %p652_p0 = scmp.ge.s32.totalorder %s946_s9, 1  ;;  %s946_s9 = sphi %s964_s9, %s12_s9  }
   0x2   : > { %p113_p1 = scmp.lt.s32.totalorder %s946_s9, 3 }
   0x4   : > { %p114_p2 = pnand %p652_p0, %p113_p1 }
   0x6   : > { %117 = sbr.rel (%p114_p2) target bundleno = 384 (0x180), region = 28 }
   0xd   : > { %s653_s11 = sshll.u32 %s648_s10, 6  ;;  %v977_v0 = vld [vmem:[%s1384_s0] sm:$0xff]  ;;  %s655_s18 = sshll.u32 %s648_s10, 2 }
   0xe   : > { %p136_p3 = scmp.lt.s32.totalorder %s653_s11, 127  ;;  %691 = vmatprep.mubr.f32.mxu0 %v977_v0  ;;  %725 = vmatprep.mubr.f32.mxu1 %v977_v0  ;;  %p142_p4 = scmp.lt.s32.totalorder %s655_s18, 7 }
  0x10   : > { %s1418_s11 = smov (!%p136_p3, %s653_s11), 127  ;;  %s1420_s18 = smov (!%p142_p4, %s655_s18), 7 }
  0x11   : > { %s654_s14 = sshll.u32 %s1418_s11, 3  ;;  %s656_s19 = sshll.u32 %s1420_s18, 3 }
  0x12   : > { %s984_s17 = scalar_lea.vmem %s1385_s1, %s654_s14  ;;  %s145_s22 = scalar_lea.vmem %s1386_s2, %s656_s19 }
  0x13   : > { %v987_v1 = vld [vmem:[%s984_s17 + $0x80] sm:$0xff]  ;;  %v990_v2 = vld [vmem:[%s984_s17 + $0x88] sm:$0xff]  ;;  %v1017_v12 = vld [vmem:[%s984_s17 + $0x90] sm:$0xff] }
  0x14   : > { %v993_v3 = vld [vmem:[%s984_s17 + $0x180] sm:$0xff]  ;;  %v795_v4 = vpack.c.bf16 %v990_v2, %v987_v1  ;;  %v998_v5 = vld [vmem:[%s984_s17 + $0x188] sm:$0xff]  ;;  %v1022_v14 = vld [vmem:[%s984_s17 + $0x98] sm:$0xff] }
  0x15   : > { %v1001_v6 = vld [vmem:[%s984_s17] sm:$0xff]  ;;  %v1004_v7 = vld [vmem:[%s984_s17 + $0x8] sm:$0xff]  ;;  %v827_v8 = vpack.c.bf16 %v998_v5, %v993_v3  ;;  %v1025_v15 = vld [vmem:[%s984_s17 + $0x190] sm:$0xff]  ;;  %v799_v17 = vpack.c.bf16 %v1022_v14, %v1017_v12 }
  0x16   : > { %v797_v9 = vpack.c.bf16 %v1004_v7, %v1001_v6  ;;  %v1011_v10 = vld [vmem:[%s984_s17 + $0x100] sm:$0xff]  ;;  %v1014_v11 = vld [vmem:[%s984_s17 + $0x108] sm:$0xff]  ;;  %796 = vmatprep.subr.bf16.mxu0 %v795_v4  ;;  %v1028_v16 = vld [vmem:[%s984_s17 + $0x198] sm:$0xff] }
  0x17   : > { %v829_v13 = vpack.c.bf16 %v1014_v11, %v1011_v10  ;;  %828 = vmatprep.subr.bf16.mxu1 %v827_v8  ;;  %v831_v18 = vpack.c.bf16 %v1028_v16, %v1025_v15  ;;  %v1035_v19 = vld [vmem:[%s984_s17 + $0x10] sm:$0xff]  ;;  %v1038_v20 = vld [vmem:[%s984_s17 + $0x18] sm:$0xff]  ;;  %v1047_v23 = vld [vmem:[%s984_s17 + $0xa0] sm:$0xff] }
  0x18   : > { %798 = vmatpush3.bf16.xpose.msra.mxu0 %v797_v9  ;;  %v1041_v21 = vld [vmem:[%s984_s17 + $0x110] sm:$0xff]  ;;  %v1044_v22 = vld [vmem:[%s984_s17 + $0x118] sm:$0xff]  ;;  %v1050_v24 = vld [vmem:[%s984_s17 + $0xa8] sm:$0xff]  ;;  %v801_v27 = vpack.c.bf16 %v1038_v20, %v1035_v19 }
  0x19   : > { %830 = vmatpush3.bf16.xpose.msra.mxu1 %v829_v13  ;;  %800 = vmatprep.subr.bf16.mxu0 %v799_v17  ;;  %v1053_v25 = vld [vmem:[%s984_s17 + $0x1a0] sm:$0xff]  ;;  %v1056_v26 = vld [vmem:[%s984_s17 + $0x1a8] sm:$0xff]  ;;  %v833_v28 = vpack.c.bf16 %v1044_v22, %v1041_v21  ;;  %v803_v29 = vpack.c.bf16 %v1050_v24, %v1047_v23  ;;  %v1079_v35 = vld [vmem:[%s984_s17 + $0xb0] sm:$0xff] }
  0x1a   : > { %832 = vmatprep.subr.bf16.mxu1 %v831_v18  ;;  %v835_v30 = vpack.c.bf16 %v1056_v26, %v1053_v25  ;;  %v1067_v31 = vld [vmem:[%s984_s17 + $0x20] sm:$0xff]  ;;  %v1070_v32 = vld [vmem:[%s984_s17 + $0x28] sm:$0xff]  ;;  %v1082_v36 = vld [vmem:[%s984_s17 + $0xb8] sm:$0xff] }
  0x1b   : > { %v1073_v33 = vld [vmem:[%s984_s17 + $0x120] sm:$0xff]  ;;  %v1076_v34 = vld [vmem:[%s984_s17 + $0x128] sm:$0xff]  ;;  %v1085_v37 = vld [vmem:[%s984_s17 + $0x1b0] sm:$0xff]  ;;  %v805_v39 = vpack.c.bf16 %v1070_v32, %v1067_v31  ;;  %v807_v41 = vpack.c.bf16 %v1082_v36, %v1079_v35 }
  0x1c   : > { %v1088_v38 = vld [vmem:[%s984_s17 + $0x1b8] sm:$0xff]  ;;  %v837_v40 = vpack.c.bf16 %v1076_v34, %v1073_v33  ;;  %v1099_v43 = vld [vmem:[%s984_s17 + $0x30] sm:$0xff]  ;;  %v1111_v47 = vld [vmem:[%s984_s17 + $0xc0] sm:$0xff] }
  0x1d   : > { %v839_v42 = vpack.c.bf16 %v1088_v38, %v1085_v37  ;;  %v1102_v44 = vld [vmem:[%s984_s17 + $0x38] sm:$0xff]  ;;  %v1105_v45 = vld [vmem:[%s984_s17 + $0x130] sm:$0xff]  ;;  %v1114_v48 = vld [vmem:[%s984_s17 + $0xc8] sm:$0xff] }
  0x1e   : > { %v1108_v46 = vld [vmem:[%s984_s17 + $0x138] sm:$0xff]  ;;  %v1117_v49 = vld [vmem:[%s984_s17 + $0x1c0] sm:$0xff]  ;;  %v1120_v50 = vld [vmem:[%s984_s17 + $0x1c8] sm:$0xff]  ;;  %v809_v51 = vpack.c.bf16 %v1102_v44, %v1099_v43  ;;  %v811_v53 = vpack.c.bf16 %v1114_v48, %v1111_v47 }
  0x1f   : > { %v841_v52 = vpack.c.bf16 %v1108_v46, %v1105_v45  ;;  %v843_v54 = vpack.c.bf16 %v1120_v50, %v1117_v49  ;;  %v1131_v55 = vld [vmem:[%s984_s17 + $0x40] sm:$0xff]  ;;  %v1134_v56 = vld [vmem:[%s984_s17 + $0x48] sm:$0xff]  ;;  %v1143_v59 = vld [vmem:[%s984_s17 + $0xd0] sm:$0xff] }
  0x20   : > { %802 = vmatpush3.bf16.xpose.msra.mxu0 %v801_v27  ;;  %v1137_v57 = vld [vmem:[%s984_s17 + $0x140] sm:$0xff]  ;;  %v1140_v58 = vld [vmem:[%s984_s17 + $0x148] sm:$0xff]  ;;  %v1146_v60 = vld [vmem:[%s984_s17 + $0xd8] sm:$0xff]  ;;  %v813_v63 = vpack.c.bf16 %v1134_v56, %v1131_v55 }
  0x21   : > { %834 = vmatpush3.bf16.xpose.msra.mxu1 %v833_v28  ;;  %804 = vmatprep.subr.bf16.mxu0 %v803_v29  ;;  %v1149_v61 = vld [vmem:[%s984_s17 + $0x1d0] sm:$0xff]  ;;  %v1152_v62 = vld [vmem:[%s984_s17 + $0x1d8] sm:$0xff]  ;;  %v845_v4 = vpack.c.bf16 %v1140_v58, %v1137_v57  ;;  %v815_v8 = vpack.c.bf16 %v1146_v60, %v1143_v59  ;;  %v1175_v28 = vld [vmem:[%s984_s17 + $0xe0] sm:$0xff] }
  0x22   : > { %836 = vmatprep.subr.bf16.mxu1 %v835_v30  ;;  %v847_v9 = vpack.c.bf16 %v1152_v62, %v1149_v61  ;;  %v1163_v13 = vld [vmem:[%s984_s17 + $0x50] sm:$0xff]  ;;  %v1166_v17 = vld [vmem:[%s984_s17 + $0x58] sm:$0xff]  ;;  %1397 = vst [vmem:[#allocation2_spill] sm:$0xff] %v1175_v28  ;;  %v1178_v29 = vld [vmem:[%s984_s17 + $0xe8] sm:$0xff] }
  0x23   : > { %v1169_v18 = vld [vmem:[%s984_s17 + $0x150] sm:$0xff]  ;;  %v1172_v27 = vld [vmem:[%s984_s17 + $0x158] sm:$0xff]  ;;  %1398 = vst [vmem:[#allocation3_spill] sm:$0xff] %v1178_v29  ;;  %v1181_v30 = vld [vmem:[%s984_s17 + $0x1e0] sm:$0xff] }
  0x24   : > { %1399 = vst [vmem:[#allocation4_spill] sm:$0xff] %v1181_v30 }
  0x28   : > { %806 = vmatpush3.bf16.xpose.msra.mxu0 %v805_v39  ;;  %v1184_v39 = vld [vmem:[%s984_s17 + $0x1e8] sm:$0xff] }
  0x29   : > { %838 = vmatpush3.bf16.xpose.msra.mxu1 %v837_v40  ;;  %808 = vmatprep.subr.bf16.mxu0 %v807_v41  ;;  %1400 = vst [vmem:[#allocation5_spill] sm:$0xff] %v1184_v39  ;;  %v817_v40 = vpack.c.bf16 %v1166_v17, %v1163_v13  ;;  %v849_v41 = vpack.c.bf16 %v1172_v27, %v1169_v18 }
  0x2a   : > { %840 = vmatprep.subr.bf16.mxu1 %v839_v42  ;;  %v819_v42 = vpack.c.bf16 %v1178_v29, %v1175_v28  ;;  %v371_v29 = vmul.f32 %v990_v2, %v990_v2  ;;  %v1231_v28 = vld [vmem:[%s984_s17 + $0x70] sm:$0xff] }
  0x30   : > { %810 = vmatpush3.bf16.xpose.msra.mxu0 %v809_v51  ;;  %v851_v51 = vpack.c.bf16 %v1184_v39, %v1181_v30  ;;  %v370_v30 = vmul.f32 %v987_v1, %v987_v1 }
  0x31   : > { %842 = vmatpush3.bf16.xpose.msra.mxu1 %v841_v52  ;;  %812 = vmatprep.subr.bf16.mxu0 %v811_v53  ;;  %v1195_v52 = vld [vmem:[%s984_s17 + $0x60] sm:$0xff]  ;;  %v1198_v53 = vld [vmem:[%s984_s17 + $0x68] sm:$0xff] }
  0x32   : > { %844 = vmatprep.subr.bf16.mxu1 %v843_v54  ;;  %1401 = vst [vmem:[#allocation6_spill] sm:$0xff] %v1198_v53  ;;  %v1201_v54 = vld [vmem:[%s984_s17 + $0x160] sm:$0xff] }
  0x38   : > { %814 = vmatpush3.bf16.xpose.msra.mxu0 %v813_v63  ;;  %v1204_v63 = vld [vmem:[%s984_s17 + $0x168] sm:$0xff] }
  0x39   : > { %846 = vmatpush3.bf16.xpose.msra.mxu1 %v845_v4  ;;  %816 = vmatprep.subr.bf16.mxu0 %v815_v8  ;;  %1402 = vst [vmem:[#allocation7_spill] sm:$0xff] %v1204_v63  ;;  %v1207_v4 = vld [vmem:[%s984_s17 + $0xf0] sm:$0xff]  ;;  %v1210_v8 = vld [vmem:[%s984_s17 + $0xf8] sm:$0xff] }
  0x3a   : > { %848 = vmatprep.subr.bf16.mxu1 %v847_v9  ;;  %1403 = vst [vmem:[#allocation8_spill] sm:$0xff] %v1210_v8  ;;  %v1213_v9 = vld [vmem:[%s984_s17 + $0x1f0] sm:$0xff] }
  0x3b   : > { %1404 = vst [vmem:[#allocation9_spill] sm:$0xff] %v1213_v9 }
  0x40   : > { %818 = vmatpush3.bf16.xpose.msra.mxu0 %v817_v40  ;;  %v1216_v40 = vld [vmem:[%s984_s17 + $0x1f8] sm:$0xff] }
  0x41   : > { %850 = vmatpush3.bf16.xpose.msra.mxu1 %v849_v41  ;;  %820 = vmatprep.subr.bf16.mxu0 %v819_v42  ;;  %1405 = vst [vmem:[#allocation10_spill] sm:$0xff] %v1216_v40  ;;  %v821_v41 = vpack.c.bf16 %v1198_v53, %v1195_v52  ;;  %v853_v42 = vpack.c.bf16 %v1204_v63, %v1201_v54  ;;  %v1234_v53 = vld [vmem:[%s984_s17 + $0x78] sm:$0xff] }
  0x42   : > { %852 = vmatprep.subr.bf16.mxu1 %v851_v51  ;;  %v823_v51 = vpack.c.bf16 %v1210_v8, %v1207_v4  ;;  %v855_v39 = vpack.c.bf16 %v1216_v40, %v1213_v9  ;;  %v402_v63 = vmul.f32 %v993_v3, %v993_v3  ;;  %v403_v8 = vmul.f32 %v998_v5, %v998_v5  ;;  %v1244_v40 = vld [vmem:[%s984_s17 + $0x178] sm:$0xff] }
  0x43   : > { %1406 = vst [vmem:[#allocation11_spill] sm:$0xff] %v1244_v40  ;;  %v825_v1 = vpack.c.bf16 %v1234_v53, %v1231_v28  ;;  %v354_v9 = vmul.f32 %v1001_v6, %v1001_v6  ;;  %v355_v3 = vmul.f32 %v1004_v7, %v1004_v7  ;;  %v386_v5 = vmul.f32 %v1011_v10, %v1011_v10 }
  0x44   : > { %v404_v6 = vmul.f32 %v1025_v15, %v1025_v15  ;;  %v405_v7 = vmul.f32 %v1028_v16, %v1028_v16  ;;  %v389_v15 = vmul.f32 %v1044_v22, %v1044_v22  ;;  %v374_v16 = vmul.f32 %v1047_v23, %v1047_v23 }
  0x45   : > { %v861_v10 = vpack.c.bf16 %v355_v3, %v354_v9  ;;  %v358_v23 = vmul.f32 %v1067_v31, %v1067_v31  ;;  %v408_v31 = vmul.f32 %v1085_v37, %v1085_v37  ;;  %v393_v37 = vmul.f32 %v1108_v46, %v1108_v46 }
  0x46   : > { %v362_v46 = vmul.f32 %v1131_v55, %v1131_v55  ;;  %v412_v55 = vmul.f32 %v1149_v61, %v1149_v61  ;;  %v397_v61 = vmul.f32 %v1172_v27, %v1172_v27  ;;  %v366_v27 = vmul.f32 %v1195_v52, %v1195_v52  ;;  %v1414_v52 = vld [vmem:[#allocation9_spill] sm:$0xff] }
  0x48   : > { %822 = vmatpush3.bf16.xpose.msra.mxu0 %v821_v41  ;;  %v1241_v41 = vld [vmem:[%s984_s17 + $0x170] sm:$0xff] }
  0x49   : > { %854 = vmatpush3.bf16.xpose.msra.mxu1 %v853_v42  ;;  %824 = vmatprep.subr.bf16.mxu0 %v823_v51  ;;  %v857_v2 = vpack.c.bf16 %v1244_v40, %v1241_v41  ;;  %v859_v42 = vpack.c.bf16 %v371_v29, %v370_v30  ;;  %v891_v51 = vpack.c.bf16 %v403_v8, %v402_v63 }
  0x4a   : > { %856 = vmatprep.subr.bf16.mxu1 %v855_v39  ;;  %v387_v39 = vmul.f32 %v1014_v11, %v1014_v11  ;;  %v372_v40 = vmul.f32 %v1017_v12, %v1017_v12  ;;  %v373_v29 = vmul.f32 %v1022_v14, %v1022_v14  ;;  %v895_v8 = vpack.c.bf16 %v405_v7, %v404_v6 }
  0x4b   : > { %v356_v11 = vmul.f32 %v1035_v19, %v1035_v19  ;;  %v357_v12 = vmul.f32 %v1038_v20, %v1038_v20  ;;  %v388_v14 = vmul.f32 %v1041_v21, %v1041_v21  ;;  %v375_v19 = vmul.f32 %v1050_v24, %v1050_v24 }
  0x4c   : > { %v893_v30 = vpack.c.bf16 %v387_v39, %v386_v5  ;;  %v863_v63 = vpack.c.bf16 %v373_v29, %v372_v40  ;;  %v406_v20 = vmul.f32 %v1053_v25, %v1053_v25  ;;  %v407_v21 = vmul.f32 %v1056_v26, %v1056_v26 }
  0x4d   : > { %v865_v22 = vpack.c.bf16 %v357_v12, %v356_v11  ;;  %v897_v9 = vpack.c.bf16 %v389_v15, %v388_v14  ;;  %v867_v40 = vpack.c.bf16 %v375_v19, %v374_v16  ;;  %v359_v24 = vmul.f32 %v1070_v32, %v1070_v32  ;;  %v1408_v12 = vld [vmem:[#allocation3_spill] sm:$0xff] }
  0x4e   : > { %v390_v25 = vmul.f32 %v1073_v33, %v1073_v33  ;;  %v391_v26 = vmul.f32 %v1076_v34, %v1076_v34  ;;  %v409_v32 = vmul.f32 %v1088_v38, %v1088_v38  ;;  %v360_v34 = vmul.f32 %v1099_v43, %v1099_v43 }
  0x4f   : > { %v869_v33 = vpack.c.bf16 %v359_v24, %v358_v23  ;;  %v378_v38 = vmul.f32 %v1111_v47, %v1111_v47  ;;  %v379_v39 = vmul.f32 %v1114_v48, %v1114_v48  ;;  %v410_v43 = vmul.f32 %v1117_v49, %v1117_v49 }
  0x50   : > { %826 = vmatpush3.bf16.xpose.msra.mxu0 %v825_v1  ;;  %v899_v1 = vpack.c.bf16 %v407_v21, %v406_v20  ;;  %v903_v5 = vpack.c.bf16 %v409_v32, %v408_v31  ;;  %v363_v47 = vmul.f32 %v1134_v56, %v1134_v56  ;;  %v394_v48 = vmul.f32 %v1137_v57, %v1137_v57 }
  0x51   : > { %858 = vmatpush3.bf16.xpose.msra.mxu1 %v857_v2  ;;  %860 = vmatprep.subr.bf16.mxu0 %v859_v42  ;;  %v376_v2 = vmul.f32 %v1079_v35, %v1079_v35  ;;  %v377_v42 = vmul.f32 %v1082_v36, %v1082_v36  ;;  %v361_v35 = vmul.f32 %v1102_v44, %v1102_v44 }
  0x52   : > { %892 = vmatprep.subr.bf16.mxu1 %v891_v51  ;;  %v901_v51 = vpack.c.bf16 %v391_v26, %v390_v25  ;;  %v392_v36 = vmul.f32 %v1105_v45, %v1105_v45  ;;  %v411_v44 = vmul.f32 %v1120_v50, %v1120_v50  ;;  %v875_v6 = vpack.c.bf16 %v379_v39, %v378_v38  ;;  %v1413_v25 = vld [vmem:[#allocation8_spill] sm:$0xff] }
  0x53   : > { %v871_v3 = vpack.c.bf16 %v377_v42, %v376_v2  ;;  %v873_v45 = vpack.c.bf16 %v361_v35, %v360_v34  ;;  %v395_v49 = vmul.f32 %v1140_v58, %v1140_v58  ;;  %v380_v50 = vmul.f32 %v1143_v59, %v1143_v59  ;;  %v1415_v42 = vld [vmem:[#allocation10_spill] sm:$0xff]  ;;  %v1416_v34 = vld [vmem:[#allocation11_spill] sm:$0xff] }
  0x54   : > { %v905_v29 = vpack.c.bf16 %v393_v37, %v392_v36  ;;  %v907_v7 = vpack.c.bf16 %v411_v44, %v410_v43  ;;  %v413_v56 = vmul.f32 %v1152_v62, %v1152_v62  ;;  %v877_v57 = vpack.c.bf16 %v363_v47, %v362_v46  ;;  %v1407_v62 = vld [vmem:[#allocation2_spill] sm:$0xff] }
  0x55   : > { %v364_v58 = vmul.f32 %v1163_v13, %v1163_v13  ;;  %v365_v59 = vmul.f32 %v1166_v17, %v1166_v17  ;;  %v382_v11 = vmul.f32 %v1407_v62, %v1407_v62  ;;  %v383_v14 = vmul.f32 %v1408_v12, %v1408_v12  ;;  %v1409_v13 = vld [vmem:[#allocation4_spill] sm:$0xff]  ;;  %v1410_v17 = vld [vmem:[#allocation5_spill] sm:$0xff] }
  0x56   : > { %v414_v15 = vmul.f32 %v1409_v13, %v1409_v13  ;;  %v415_v16 = vmul.f32 %v1410_v17, %v1410_v17  ;;  %v384_v24 = vmul.f32 %v1207_v4, %v1207_v4  ;;  %v385_v26 = vmul.f32 %v1413_v25, %v1413_v25 }
  0x57   : > { %692 = vmatmul.mubr.f32.vlgmr.msra.gmra.mrb[0].mxu0 %v977_v0  ;;  %v883_v20 = vpack.c.bf16 %v383_v14, %v382_v11  ;;  %v416_v2 = vmul.f32 %v1414_v52, %v1414_v52  ;;  %v417_v31 = vmul.f32 %v1415_v42, %v1415_v42  ;;  %v369_v4 = vmul.f32 %v1234_v53, %v1234_v53 }
  0x58   : > { %726 = vmatmul.mubr.f32.vlgmr.msra.gmra.mrb[0].mxu1 %v977_v0  ;;  %862 = vmatpush3.bf16.xpose.msra.mxu0 %v861_v10  ;;  %v948_v0 = vmov 1.0   ;;  %v381_v10 = vmul.f32 %v1146_v60, %v1146_v60  ;;  %v396_v60 = vmul.f32 %v1169_v18, %v1169_v18  ;;  %v881_v18 = vpack.c.bf16 %v365_v59, %v364_v58 }
  0x59   : > { %894 = vmatpush3.bf16.xpose.msra.mxu1 %v893_v30  ;;  %864 = vmatprep.subr.bf16.mxu0 %v863_v63  ;;  %v909_v30 = vpack.c.bf16 %v395_v49, %v394_v48  ;;  %v915_v21 = vpack.c.bf16 %v415_v16, %v414_v15  ;;  %v401_v35 = vmul.f32 %v1416_v34, %v1416_v34 }
  0x5a   : > { %896 = vmatprep.subr.bf16.mxu1 %v895_v8  ;;  %759 = vmatprep.mubr.f32.mxu0 %v948_v0  ;;  %v879_v63 = vpack.c.bf16 %v381_v10, %v380_v50  ;;  %v911_v8 = vpack.c.bf16 %v413_v56, %v412_v55  ;;  %v913_v19 = vpack.c.bf16 %v397_v61, %v396_v60 }
  0x5b   : > { %793 = vmatprep.mubr.f32.mxu1 %v948_v0 }
  0x60   : > { %866 = vmatpush3.bf16.xpose.msra.mxu0 %v865_v22  ;;  %v1411_v22 = vld [vmem:[#allocation6_spill] sm:$0xff] }
  0x61   : > { %898 = vmatpush3.bf16.xpose.msra.mxu1 %v897_v9  ;;  %868 = vmatprep.subr.bf16.mxu0 %v867_v40  ;;  %v367_v9 = vmul.f32 %v1411_v22, %v1411_v22  ;;  %v398_v40 = vmul.f32 %v1201_v54, %v1201_v54 }
  0x62   : > { %900 = vmatprep.subr.bf16.mxu1 %v899_v1  ;;  %v1412_v1 = vld [vmem:[#allocation7_spill] sm:$0xff] }
  0x63   : > { %v399_v23 = vmul.f32 %v1412_v1, %v1412_v1  ;;  %v885_v54 = vpack.c.bf16 %v367_v9, %v366_v27 }
  0x65   : > { %v917_v32 = vpack.c.bf16 %v399_v23, %v398_v40 }
  0x68   : > { %870 = vmatpush3.bf16.xpose.msra.mxu0 %v869_v33  ;;  %v887_v33 = vpack.c.bf16 %v385_v26, %v384_v24 }
  0x69   : > { %902 = vmatpush3.bf16.xpose.msra.mxu1 %v901_v51  ;;  %872 = vmatprep.subr.bf16.mxu0 %v871_v3  ;;  %v919_v51 = vpack.c.bf16 %v417_v31, %v416_v2  ;;  %v368_v3 = vmul.f32 %v1231_v28, %v1231_v28 }
  0x6a   : > { %904 = vmatprep.subr.bf16.mxu1 %v903_v5  ;;  %v400_v5 = vmul.f32 %v1241_v41, %v1241_v41 }
  0x6b   : > { %v889_v36 = vpack.c.bf16 %v369_v4, %v368_v3 }
  0x6c   : > { %v921_v37 = vpack.c.bf16 %v401_v35, %v400_v5 }
  0x70   : > { %874 = vmatpush3.bf16.xpose.msra.mxu0 %v873_v45 }
  0x71   : > { %906 = vmatpush3.bf16.xpose.msra.mxu1 %v905_v29  ;;  %876 = vmatprep.subr.bf16.mxu0 %v875_v6  ;;  %v568_v29 = vlaneseq }
  0x72   : > { %908 = vmatprep.subr.bf16.mxu1 %v907_v7 }
  0x78   : > { %878 = vmatpush3.bf16.xpose.msra.mxu0 %v877_v57 }
  0x79   : > { %910 = vmatpush3.bf16.xpose.msra.mxu1 %v909_v30  ;;  %880 = vmatprep.subr.bf16.mxu0 %v879_v63 }
  0x7a   : > { %912 = vmatprep.subr.bf16.mxu1 %v911_v8 }
  0x80   : > { %882 = vmatpush3.bf16.xpose.msra.mxu0 %v881_v18 }
  0x81   : > { %914 = vmatpush3.bf16.xpose.msra.mxu1 %v913_v19  ;;  %884 = vmatprep.subr.bf16.mxu0 %v883_v20 }
  0x82   : > { %916 = vmatprep.subr.bf16.mxu1 %v915_v21 }
  0x88   : > { %886 = vmatpush3.bf16.xpose.msra.mxu0 %v885_v54 }
  0x89   : > { %918 = vmatpush3.bf16.xpose.msra.mxu1 %v917_v32  ;;  %888 = vmatprep.subr.bf16.mxu0 %v887_v33 }
  0x8a   : > { %920 = vmatprep.subr.bf16.mxu1 %v919_v51 }
  0x90   : > { %890 = vmatpush3.bf16.xpose.msra.mxu0 %v889_v36 }
  0x91   : > { %922 = vmatpush3.bf16.xpose.msra.mxu1 %v921_v37 }
  0x97   : > { %760 = vmatmul.mubr.f32.vlgmr.msra.gmra.mrb[2].mxu0 %v948_v0 }
  0x98   : > { %794 = vmatmul.mubr.f32.vlgmr.msra.gmra.mrb[2].mxu1 %v948_v0  ;;  %v569_v0 = vshrl.u32 %v568_v29, 7 }
  0x9a   : > { %v570_v48 = vsub.s32 0, %v569_v0 }
 0x12a   : > { %v278_v28 = vpop.f32.mrb[0].mxu0 }
 0x12b   : > { %v280_v53 = vpop.f32.mrb[1].mxu0  ;;  %v349_v38 = vpop.f32.mrb[0].mxu1 }
 0x12c   : > { %v351_v39 = vpop.f32.mrb[1].mxu1 }
 0x16a   : > { %v484_v41 = vpop.f32.mrb[2].mxu0 }
 0x16b   : > { %v560_v43 = vmax.f32 %v484_v41, 1e-24  ;;  %v555_v44 = vpop.f32.mrb[2].mxu1  ;;  %v486_v45 = vpop.f32.mrb[3].mxu0 }
 0x16c   : > { %v562_v6 = vmax.f32 %v555_v44, 1e-24  ;;  %v561_v7 = vmax.f32 %v486_v45, 1e-24  ;;  %v557_v46 = vpop.f32.mrb[3].mxu1 }
 0x16d   : > { %932 = vrsqrt.f32 %v560_v43  ;;  %v563_v47 = vmax.f32 %v557_v46, 1e-24 }
 0x16e   : > { %934 = vrsqrt.f32 %v562_v6 }
 0x16f   : > { %936 = vrsqrt.f32 %v561_v7 }
 0x170   : > { %938 = vrsqrt.f32 %v563_v47 }
 0x177   : > { %v933_v49 = vpop.eup %932 }
 0x178   : > { %v935_v50 = vpop.eup %934  ;;  %v571_v10 = vrot.slane %v933_v49, %v570_v48 }
 0x179   : > { %v937_v55 = vpop.eup %936  ;;  %v579_v56 = vrot.slane %v935_v50, %v570_v48 }
 0x17a   : > { %v939_v57 = vpop.eup %938  ;;  %v584_v30 = vmul.f32 %v571_v10, %v278_v28  ;;  %v575_v63 = vrot.slane %v937_v55, %v570_v48 }
 0x17b   : > { %v586_v8 = vmul.f32 %v579_v56, %v349_v38  ;;  %v583_v58 = vrot.slane %v939_v57, %v570_v48 }
 0x17c   : > { %588 = vst [vmem:[%s145_s22] sm:$0xff] %v584_v30  ;;  %v585_v59 = vmul.f32 %v575_v63, %v280_v53 }
 0x17d   : > { %v587_v60 = vmul.f32 %v583_v58, %v351_v39  ;;  %590 = vst [vmem:[%s145_s22 + $0x10] sm:$0xff] %v586_v8 }
 0x17e   : > { %589 = vst [vmem:[%s145_s22 + $0x8] sm:$0xff] %v585_v59 }
 0x17f   : > { %591 = vst [vmem:[%s145_s22 + $0x18] sm:$0xff] %v587_v60 }
 0x180 PF: > { %s12_s9 = sadd.s32 1, %s946_s9  }
 0x181   : > { %p9_p5 = scmp.ge.s32.totalorder %s12_s9, 4  }
 0x183   :  { %11 = sbr.rel (!%p9_p5) target bundleno = 1 (0x1), region = 58 }

</bundles_post_ra>
